<compile_context>
chip_gen: v7x
topology: tpu7x:2x2x1
jax: 0.10.0
libtpu: 0.0.40
codegen_flags: <defaults>
</compile_context>

<pallas_src>
import jax
import jax.numpy as jnp
from jax.experimental import pallas as pl
from jax.experimental.pallas import tpu as pltpu

_EPS = 1e-5


def _vmem_config():
    """(vmem_limit_bytes, per-step block budget) sized per TPU generation."""
    try:
        cap = getattr(pltpu.get_tpu_info(), "vmem_capacity_bytes", None)
    except Exception:
        cap = None
    if cap is None:
        cap = 64 * 1024 * 1024                    # assume v7x-sized (safe everywhere)
    if cap >= 96 * 1024 * 1024:                   # v5e / v6e: 128 MiB physical VMEM
        return 64 * 1024 * 1024, 12 * 1024 * 1024
    return 40 * 1024 * 1024, 6 * 1024 * 1024      # v7x: 64 MiB physical VMEM


def _pick_tiles(N, Cin, Cout, HW, xbytes, obytes, budget):
    """Choose (batch-block Bn, lane tile L, use_vpu_conv).

    Budget accounts for Buffered(3) x-blocks, double-buffered out-blocks and a
    conservative estimate of in-kernel f32 temporaries, so `budget` bounds the
    total resident VMEM per pipeline stage.
    """
    vpu_conv = Cin <= 8
    f32_temps = 4 * Cin + 4 * Cout * (Cin if vpu_conv else 2)
    per_px = 3 * Cin * xbytes + 2 * Cout * obytes + f32_temps
    max_px = max(128, budget // per_px)
    L = max(128, min(max_px, 65536) // 128 * 128)
    if L >= HW:
        # Whole spatial row fits in one (always-legal) full-extent lane block;
        # batch-block several images per grid step to amortize per-step cost.
        L = HW
        Bn = max(1, min(max_px // max(HW, 1), 8, N))
        while N % Bn:                              # full blocks only -> exact stats
            Bn -= 1
    else:
        Bn = 1
    return Bn, L, vpu_conv


def conv2dn_forward(x_nchw, conv_weight, bn_gamma, bn_beta, *, eps=_EPS):
    """Conv2DN forward.  x: (N,Cin,H,W) NCHW; conv_weight: (Cout,Cin,1,1)."""
    N, Cin, H, W = x_nchw.shape
    Cout = conv_weight.shape[0]
    HW = H * W
    M = N * HW

    vmem_limit, block_budget = _vmem_config()
    xbytes = jnp.dtype(x_nchw.dtype).itemsize
    obytes = xbytes
    Bn, L, use_vpu_conv = _pick_tiles(N, Cin, Cout, HW, xbytes, obytes, block_budget)

    num_nb = N // Bn
    num_l = pl.cdiv(HW, L)
    needs_mask = (HW % L) != 0                      # only possible when Bn == 1
    n_steps = num_nb * num_l

    x3 = x_nchw.reshape(N, Cin, HW)                 # pure reshape, NCHW kept
    w_mat = conv_weight.reshape(Cout, Cin).astype(jnp.float32)

    def _x_spec():
        kwargs = {}
        if n_steps >= 3:                            # deeper input buffering only if useful
            kwargs["pipeline_mode"] = pl.Buffered(3)
        return pl.BlockSpec((Bn, Cin, L), lambda nb, l: (nb, 0, l), **kwargs)

    # ---------------- pass 1: per-batch-block Gram matrix + column sums -----
    def stats_kernel(x_ref, gram_ref, colsum_ref):
        l = pl.program_id(1)

        @pl.when(l == 0)
        def _():
            gram_ref[...] = jnp.zeros_like(gram_ref)
            colsum_ref[...] = jnp.zeros_like(colsum_ref)

        x = x_ref[...].astype(jnp.float32)          # (Bn, Cin, L) lane-dense
        if needs_mask:                              # static trace-time branch
            lane = jax.lax.broadcasted_iota(jnp.int32, (1, 1, L), 2)
            x = jnp.where((l * L + lane) < HW, x, 0.0)

        g = jnp.zeros((Cin, Cin), jnp.float32)
        s = jnp.zeros((Cin, 1), jnp.float32)
        for b in range(Bn):                         # static unroll, Bn <= 8
            xb = x[b]                               # (Cin, L)
            g = g + jax.lax.dot_general(            # X X^T (contract over lanes, MXU)
                xb, xb, (((1,), (1,)), ((), ())),
                preferred_element_type=jnp.float32)
            s = s + jnp.sum(xb, axis=1, keepdims=True)
        gram_ref[...] += g
        colsum_ref[...] += s

    gram_p, colsum_p = pl.pallas_call(
        stats_kernel,
        out_shape=(jax.ShapeDtypeStruct((num_nb, Cin, Cin), jnp.float32),
                   jax.ShapeDtypeStruct((num_nb, Cin, 1), jnp.float32)),
        grid=(num_nb, num_l),
        in_specs=[_x_spec()],
        out_specs=(pl.BlockSpec((None, Cin, Cin), lambda nb, l: (nb, 0, 0)),
                   pl.BlockSpec((None, Cin, 1), lambda nb, l: (nb, 0, 0))),
        compiler_params=pltpu.CompilerParams(
            # Per-batch-block partial accumulators -> the batch axis can shard
            # across v7x's two TensorCores; only the lane axis accumulates.
            dimension_semantics=("parallel", "arbitrary"),
            vmem_limit_bytes=vmem_limit),
    )(x3)

    # -------- tiny glue: reduce partials, fold BN into weight / shift -------
    gram = jnp.sum(gram_p, axis=0)                  # (Cin, Cin)
    colsum = jnp.sum(colsum_p, axis=0)              # (Cin, 1)
    sum_y = w_mat @ colsum[:, 0]                    # (Cout,)
    mean = sum_y / M
    ey2 = jnp.einsum("oc,cd,od->o", w_mat, gram, w_mat) / M
    var = jnp.maximum(ey2 - mean * mean, 0.0)       # biased batch variance
    inv_std = jax.lax.rsqrt(var + eps)
    scale = bn_gamma.astype(jnp.float32) * inv_std  # (Cout,)
    shift = (bn_beta.astype(jnp.float32) - mean * scale).reshape(Cout, 1)
    w_scaled = w_mat * scale[:, None]               # BN scale folded into conv weight

    # ---------------- pass 2: out = (scale*W) x + shift ---------------------
    def apply_kernel(x_ref, w_ref, shift_ref, o_ref):
        x = x_ref[...].astype(jnp.float32)          # (Bn, Cin, L)
        w = w_ref[...]                              # (Cout, Cin) f32, scale folded in
        shift_v = shift_ref[...]                    # (Cout, 1)
        for b in range(Bn):                         # static unroll, Bn <= 8
            xb = x[b]                               # (Cin, L)
            if use_vpu_conv:
                # Tiny contraction: Cin broadcast-FMAs on the VPU (full-sublane
                # (Cout, L) blocks); the MXU would be >95% idle at K=Cin.
                y = w[:, 0:1] * xb[0:1, :]
                for c in range(1, Cin):
                    y = y + w[:, c:c + 1] * xb[c:c + 1, :]
            else:
                y = jnp.dot(w, xb, preferred_element_type=jnp.float32)  # MXU
            o_ref[b] = (y + shift_v).astype(o_ref.dtype)   # lane-dense store

    out3 = pl.pallas_call(
        apply_kernel,
        out_shape=jax.ShapeDtypeStruct((N, Cout, HW), x_nchw.dtype),
        grid=(num_nb, num_l),
        in_specs=[
            _x_spec(),
            pl.BlockSpec((Cout, Cin), lambda nb, l: (0, 0)),
            pl.BlockSpec((Cout, 1), lambda nb, l: (0, 0)),
        ],
        out_specs=pl.BlockSpec((Bn, Cout, L), lambda nb, l: (nb, 0, l)),
        compiler_params=pltpu.CompilerParams(
            dimension_semantics=("parallel", "parallel"),
            vmem_limit_bytes=vmem_limit),
    )(x3, w_scaled, shift)

    return out3.reshape(N, Cout, H, W)              # pure reshape, no transpose


def _reference(x_nchw, conv_weight, bn_gamma, bn_beta):
    """Pure-JAX reference of Conv2DN forward (1x1 conv + training BatchNorm)."""
    N, Cin, H, W = x_nchw.shape
    Cout = conv_weight.shape[0]
    y = jnp.einsum("nchw,oc->nohw", x_nchw, conv_weight.reshape(Cout, Cin))
    mean = jnp.mean(y, axis=(0, 2, 3), keepdims=True)
    var = jnp.mean((y - mean) ** 2, axis=(0, 2, 3), keepdims=True)
    yhat = (y - mean) / jnp.sqrt(var + _EPS)
    return yhat * bn_gamma.reshape(1, Cout, 1, 1) + bn_beta.reshape(1, Cout, 1, 1)


if __name__ == "__main__":
    key = jax.random.PRNGKey(0)
    k_x, k_w, k_g, k_b = jax.random.split(key, 4)

    N, Cin, Cout, H, W = 2, 4, 8, 16, 16

    x = jax.random.normal(k_x, (N, Cin, H, W), dtype=jnp.float32)
    # Deterministic synthetic parameters (shapes match nn.Conv2d / nn.BatchNorm2d).
    conv_weight = 0.1 * jax.random.normal(k_w, (Cout, Cin, 1, 1), dtype=jnp.float32)
    bn_gamma = 1.0 + 0.1 * jax.random.normal(k_g, (Cout,), dtype=jnp.float32)
    bn_beta = 0.1 * jax.random.normal(k_b, (Cout,), dtype=jnp.float32)

    fwd = jax.jit(conv2dn_forward)
    out = jax.block_until_ready(fwd(x, conv_weight, bn_gamma, bn_beta))

    ref = _reference(x, conv_weight, bn_gamma, bn_beta)
    assert out.shape == (N, Cout, H, W), out.shape
    max_err = float(jnp.max(jnp.abs(out - ref)))
    assert max_err < 2e-4, max_err

    print("KERNEL_OK")
</pallas_src>

<mosaic_0001>
module attributes {stable_mosaic.version = 11 : i64} {
  func.func @stats_kernel(%arg0: i32, %arg1: i32, %arg2: memref<2x4x256xf32, #tpu.memory_space<vmem>>, %arg3: memref<1x4x4xf32, #tpu.memory_space<vmem>>, %arg4: memref<1x4x1xf32, #tpu.memory_space<vmem>>) attributes {dimension_semantics = [#tpu.dimension_semantics<parallel>, #tpu.dimension_semantics<arbitrary>], iteration_bounds = array<i64: 1, 1>, scalar_prefetch = 0 : i64, scratch_operands = 0 : i64, tpu.core_type = #tpu.core_type<tc>, window_params = [{transform_indices = @transform_0, window_bounds = array<i64: 2, 4, 256>}, {transform_indices = @transform_1, window_bounds = array<i64: 1, 4, 4>}, {transform_indices = @transform_2, window_bounds = array<i64: 1, 4, 1>}]} {
    %c0_i32 = arith.constant 0 : i32
    %0 = arith.cmpi eq, %arg1, %c0_i32 : i32
    %1 = arith.extui %0 : i1 to i32
    %c0_i32_0 = arith.constant 0 : i32
    %2 = arith.cmpi ne, %1, %c0_i32_0 : i32
    scf.if %2 {
      %cst_20 = arith.constant 0.000000e+00 : f32
      %32 = vector.broadcast %cst_20 : f32 to vector<4x4xf32>
      %c0_21 = arith.constant 0 : index
      %c0_22 = arith.constant 0 : index
      %c0_23 = arith.constant 0 : index
      %33 = vector.load %arg3[%c0_21, %c0_22, %c0_23] : memref<1x4x4xf32, #tpu.memory_space<vmem>>, vector<1x4x4xf32>
      %34 = vector.shape_cast %33 : vector<1x4x4xf32> to vector<4x4xf32>
      %35 = vector.shape_cast %32 : vector<4x4xf32> to vector<1x4x4xf32>
      tpu.vector_store %arg3[%c0_21, %c0_22, %c0_23], %35 {strides = array<i32>} : memref<1x4x4xf32, #tpu.memory_space<vmem>>, vector<1x4x4xf32>,
      %cst_24 = arith.constant 0.000000e+00 : f32
      %36 = vector.broadcast %cst_24 : f32 to vector<4x1xf32>
      %c0_25 = arith.constant 0 : index
      %c0_26 = arith.constant 0 : index
      %c0_27 = arith.constant 0 : index
      %37 = vector.load %arg4[%c0_25, %c0_26, %c0_27] : memref<1x4x1xf32, #tpu.memory_space<vmem>>, vector<1x4x1xf32>
      %38 = vector.shape_cast %37 : vector<1x4x1xf32> to vector<4x1xf32>
      %39 = vector.shape_cast %36 : vector<4x1xf32> to vector<1x4x1xf32>
      tpu.vector_store %arg4[%c0_25, %c0_26, %c0_27], %39 {strides = array<i32>} : memref<1x4x1xf32, #tpu.memory_space<vmem>>, vector<1x4x1xf32>,
    } else {
    }
    %c0 = arith.constant 0 : index
    %c0_1 = arith.constant 0 : index
    %c0_2 = arith.constant 0 : index
    %3 = vector.load %arg2[%c0, %c0_1, %c0_2] : memref<2x4x256xf32, #tpu.memory_space<vmem>>, vector<2x4x256xf32>
    %cst = arith.constant 0.000000e+00 : f32
    %4 = vector.broadcast %cst : f32 to vector<4x4xf32>
    %cst_3 = arith.constant 0.000000e+00 : f32
    %5 = vector.broadcast %cst_3 : f32 to vector<4x1xf32>
    %6 = vector.extract_strided_slice %3 {offsets = [0, 0, 0], sizes = [1, 4, 256], strides = [1, 1, 1]} : vector<2x4x256xf32> to vector<1x4x256xf32>
    %7 = vector.shape_cast %6 : vector<1x4x256xf32> to vector<4x256xf32>
    %cst_4 = arith.constant dense<0.000000e+00> : vector<4x4xf32>
    %8 = tpu.matmul %7, %7, %cst_4 {dimension_numbers = #tpu.dot_dimension_numbers<[1], [1], [0], [0], [0, 0, 1, 0], [], []>} : vector<4x256xf32>, vector<4x256xf32>, vector<4x4xf32> -> vector<4x4xf32>
    %9 = arith.addf %4, %8 : vector<4x4xf32>
    %cst_5 = arith.constant dense<0.000000e+00> : vector<4xf32>
    %10 = vector.multi_reduction <add>, %7, %cst_5 [1] : vector<4x256xf32> to vector<4xf32>
    %11 = vector.shape_cast %10 : vector<4xf32> to vector<4x1xf32>
    %12 = arith.addf %5, %11 : vector<4x1xf32>
    %13 = vector.extract_strided_slice %3 {offsets = [1, 0, 0], sizes = [1, 4, 256], strides = [1, 1, 1]} : vector<2x4x256xf32> to vector<1x4x256xf32>
    %14 = vector.shape_cast %13 : vector<1x4x256xf32> to vector<4x256xf32>
    %cst_6 = arith.constant dense<0.000000e+00> : vector<4x4xf32>
    %15 = tpu.matmul %14, %14, %cst_6 {dimension_numbers = #tpu.dot_dimension_numbers<[1], [1], [0], [0], [0, 0, 1, 0], [], []>} : vector<4x256xf32>, vector<4x256xf32>, vector<4x4xf32> -> vector<4x4xf32>
    %16 = arith.addf %9, %15 : vector<4x4xf32>
    %cst_7 = arith.constant dense<0.000000e+00> : vector<4xf32>
    %17 = vector.multi_reduction <add>, %14, %cst_7 [1] : vector<4x256xf32> to vector<4xf32>
    %18 = vector.shape_cast %17 : vector<4xf32> to vector<4x1xf32>
    %19 = arith.addf %12, %18 : vector<4x1xf32>
    %c0_8 = arith.constant 0 : index
    %c0_9 = arith.constant 0 : index
    %c0_10 = arith.constant 0 : index
    %20 = vector.load %arg3[%c0_8, %c0_9, %c0_10] : memref<1x4x4xf32, #tpu.memory_space<vmem>>, vector<1x4x4xf32>
    %21 = vector.shape_cast %20 : vector<1x4x4xf32> to vector<4x4xf32>
    %22 = arith.addf %21, %16 : vector<4x4xf32>
    %c0_11 = arith.constant 0 : index
    %c0_12 = arith.constant 0 : index
    %c0_13 = arith.constant 0 : index
    %23 = vector.load %arg3[%c0_11, %c0_12, %c0_13] : memref<1x4x4xf32, #tpu.memory_space<vmem>>, vector<1x4x4xf32>
    %24 = vector.shape_cast %23 : vector<1x4x4xf32> to vector<4x4xf32>
    %25 = vector.shape_cast %22 : vector<4x4xf32> to vector<1x4x4xf32>
    tpu.vector_store %arg3[%c0_11, %c0_12, %c0_13], %25 {strides = array<i32>} : memref<1x4x4xf32, #tpu.memory_space<vmem>>, vector<1x4x4xf32>,
    %c0_14 = arith.constant 0 : index
    %c0_15 = arith.constant 0 : index
    %c0_16 = arith.constant 0 : index
    %26 = vector.load %arg4[%c0_14, %c0_15, %c0_16] : memref<1x4x1xf32, #tpu.memory_space<vmem>>, vector<1x4x1xf32>
    %27 = vector.shape_cast %26 : vector<1x4x1xf32> to vector<4x1xf32>
    %28 = arith.addf %27, %19 : vector<4x1xf32>
    %c0_17 = arith.constant 0 : index
    %c0_18 = arith.constant 0 : index
    %c0_19 = arith.constant 0 : index
    %29 = vector.load %arg4[%c0_17, %c0_18, %c0_19] : memref<1x4x1xf32, #tpu.memory_space<vmem>>, vector<1x4x1xf32>
    %30 = vector.shape_cast %29 : vector<1x4x1xf32> to vector<4x1xf32>
    %31 = vector.shape_cast %28 : vector<4x1xf32> to vector<1x4x1xf32>
    tpu.vector_store %arg4[%c0_17, %c0_18, %c0_19], %31 {strides = array<i32>} : memref<1x4x1xf32, #tpu.memory_space<vmem>>, vector<1x4x1xf32>,
    return
  }
  func.func @transform_0(%arg0: i32, %arg1: i32) -> (i32, i32, i32) {
    %c0_i32 = arith.constant 0 : i32
    %c0_i32_0 = arith.constant 0 : i32
    return %arg0, %c0_i32, %arg1 : i32, i32, i32
  }
  func.func @transform_1(%arg0: i32, %arg1: i32) -> (i32, i32, i32) {
    %c0_i32 = arith.constant 0 : i32
    %c0_i32_0 = arith.constant 0 : i32
    %c0_i32_1 = arith.constant 0 : i32
    return %arg0, %c0_i32, %c0_i32_0 : i32, i32, i32
  }
  func.func @transform_2(%arg0: i32, %arg1: i32) -> (i32, i32, i32) {
    %c0_i32 = arith.constant 0 : i32
    %c0_i32_0 = arith.constant 0 : i32
    %c0_i32_1 = arith.constant 0 : i32
    return %arg0, %c0_i32, %c0_i32_0 : i32, i32, i32
  }
}

module attributes {stable_mosaic.version = 11 : i64} {
  func.func @apply_kernel(%arg0: i32, %arg1: i32, %arg2: memref<2x4x256xf32, #tpu.memory_space<vmem>>, %arg3: memref<8x4xf32, #tpu.memory_space<vmem>>, %arg4: memref<8x1xf32, #tpu.memory_space<vmem>>, %arg5: memref<2x8x256xf32, #tpu.memory_space<vmem>>) attributes {dimension_semantics = [#tpu.dimension_semantics<parallel>, #tpu.dimension_semantics<parallel>], iteration_bounds = array<i64: 1, 1>, scalar_prefetch = 0 : i64, scratch_operands = 0 : i64, tpu.core_type = #tpu.core_type<tc>, window_params = [{transform_indices = @transform_0, window_bounds = array<i64: 2, 4, 256>}, {pipeline_mode = #tpu.pipeline_mode<synchronous>, transform_indices = @transform_1, window_bounds = array<i64: 8, 4>}, {pipeline_mode = #tpu.pipeline_mode<synchronous>, transform_indices = @transform_2, window_bounds = array<i64: 8, 1>}, {transform_indices = @transform_3, window_bounds = array<i64: 2, 8, 256>}]} {
    %c0 = arith.constant 0 : index
    %c0_0 = arith.constant 0 : index
    %c0_1 = arith.constant 0 : index
    %0 = vector.load %arg2[%c0, %c0_0, %c0_1] : memref<2x4x256xf32, #tpu.memory_space<vmem>>, vector<2x4x256xf32>
    %c0_2 = arith.constant 0 : index
    %c0_3 = arith.constant 0 : index
    %1 = vector.load %arg3[%c0_2, %c0_3] : memref<8x4xf32, #tpu.memory_space<vmem>>, vector<8x4xf32>
    %c0_4 = arith.constant 0 : index
    %c0_5 = arith.constant 0 : index
    %2 = vector.load %arg4[%c0_4, %c0_5] : memref<8x1xf32, #tpu.memory_space<vmem>>, vector<8x1xf32>
    %3 = vector.extract_strided_slice %0 {offsets = [0, 0, 0], sizes = [1, 4, 256], strides = [1, 1, 1]} : vector<2x4x256xf32> to vector<1x4x256xf32>
    %4 = vector.shape_cast %3 : vector<1x4x256xf32> to vector<4x256xf32>
    %5 = vector.extract_strided_slice %1 {offsets = [0, 0], sizes = [8, 1], strides = [1, 1]} : vector<8x4xf32> to vector<8x1xf32>
    %6 = vector.extract_strided_slice %4 {offsets = [0, 0], sizes = [1, 256], strides = [1, 1]} : vector<4x256xf32> to vector<1x256xf32>
    %7 = vector.broadcast %5 : vector<8x1xf32> to vector<8x256xf32>
    %8 = vector.broadcast %6 : vector<1x256xf32> to vector<8x256xf32>
    %9 = arith.mulf %7, %8 : vector<8x256xf32>
    %10 = vector.extract_strided_slice %1 {offsets = [0, 1], sizes = [8, 1], strides = [1, 1]} : vector<8x4xf32> to vector<8x1xf32>
    %11 = vector.extract_strided_slice %4 {offsets = [1, 0], sizes = [1, 256], strides = [1, 1]} : vector<4x256xf32> to vector<1x256xf32>
    %12 = vector.broadcast %10 : vector<8x1xf32> to vector<8x256xf32>
    %13 = vector.broadcast %11 : vector<1x256xf32> to vector<8x256xf32>
    %14 = arith.mulf %12, %13 : vector<8x256xf32>
    %15 = arith.addf %9, %14 : vector<8x256xf32>
    %16 = vector.extract_strided_slice %1 {offsets = [0, 2], sizes = [8, 1], strides = [1, 1]} : vector<8x4xf32> to vector<8x1xf32>
    %17 = vector.extract_strided_slice %4 {offsets = [2, 0], sizes = [1, 256], strides = [1, 1]} : vector<4x256xf32> to vector<1x256xf32>
    %18 = vector.broadcast %16 : vector<8x1xf32> to vector<8x256xf32>
    %19 = vector.broadcast %17 : vector<1x256xf32> to vector<8x256xf32>
    %20 = arith.mulf %18, %19 : vector<8x256xf32>
    %21 = arith.addf %15, %20 : vector<8x256xf32>
    %22 = vector.extract_strided_slice %1 {offsets = [0, 3], sizes = [8, 1], strides = [1, 1]} : vector<8x4xf32> to vector<8x1xf32>
    %23 = vector.extract_strided_slice %4 {offsets = [3, 0], sizes = [1, 256], strides = [1, 1]} : vector<4x256xf32> to vector<1x256xf32>
    %24 = vector.broadcast %22 : vector<8x1xf32> to vector<8x256xf32>
    %25 = vector.broadcast %23 : vector<1x256xf32> to vector<8x256xf32>
    %26 = arith.mulf %24, %25 : vector<8x256xf32>
    %27 = arith.addf %21, %26 : vector<8x256xf32>
    %28 = vector.broadcast %2 : vector<8x1xf32> to vector<8x256xf32>
    %29 = arith.addf %27, %28 : vector<8x256xf32>
    %c0_6 = arith.constant 0 : index
    %c0_7 = arith.constant 0 : index
    %c0_8 = arith.constant 0 : index
    %30 = vector.load %arg5[%c0_6, %c0_7, %c0_8] : memref<2x8x256xf32, #tpu.memory_space<vmem>>, vector<1x8x256xf32>
    %31 = vector.shape_cast %30 : vector<1x8x256xf32> to vector<8x256xf32>
    %32 = vector.shape_cast %29 : vector<8x256xf32> to vector<1x8x256xf32>
    tpu.vector_store %arg5[%c0_6, %c0_7, %c0_8], %32 {strides = array<i32>} : memref<2x8x256xf32, #tpu.memory_space<vmem>>, vector<1x8x256xf32>,
    %33 = vector.extract_strided_slice %0 {offsets = [1, 0, 0], sizes = [1, 4, 256], strides = [1, 1, 1]} : vector<2x4x256xf32> to vector<1x4x256xf32>
    %34 = vector.shape_cast %33 : vector<1x4x256xf32> to vector<4x256xf32>
    %35 = vector.extract_strided_slice %1 {offsets = [0, 0], sizes = [8, 1], strides = [1, 1]} : vector<8x4xf32> to vector<8x1xf32>
    %36 = vector.extract_strided_slice %34 {offsets = [0, 0], sizes = [1, 256], strides = [1, 1]} : vector<4x256xf32> to vector<1x256xf32>
    %37 = vector.broadcast %35 : vector<8x1xf32> to vector<8x256xf32>
    %38 = vector.broadcast %36 : vector<1x256xf32> to vector<8x256xf32>
    %39 = arith.mulf %37, %38 : vector<8x256xf32>
    %40 = vector.extract_strided_slice %1 {offsets = [0, 1], sizes = [8, 1], strides = [1, 1]} : vector<8x4xf32> to vector<8x1xf32>
    %41 = vector.extract_strided_slice %34 {offsets = [1, 0], sizes = [1, 256], strides = [1, 1]} : vector<4x256xf32> to vector<1x256xf32>
    %42 = vector.broadcast %40 : vector<8x1xf32> to vector<8x256xf32>
    %43 = vector.broadcast %41 : vector<1x256xf32> to vector<8x256xf32>
    %44 = arith.mulf %42, %43 : vector<8x256xf32>
    %45 = arith.addf %39, %44 : vector<8x256xf32>
    %46 = vector.extract_strided_slice %1 {offsets = [0, 2], sizes = [8, 1], strides = [1, 1]} : vector<8x4xf32> to vector<8x1xf32>
    %47 = vector.extract_strided_slice %34 {offsets = [2, 0], sizes = [1, 256], strides = [1, 1]} : vector<4x256xf32> to vector<1x256xf32>
    %48 = vector.broadcast %46 : vector<8x1xf32> to vector<8x256xf32>
    %49 = vector.broadcast %47 : vector<1x256xf32> to vector<8x256xf32>
    %50 = arith.mulf %48, %49 : vector<8x256xf32>
    %51 = arith.addf %45, %50 : vector<8x256xf32>
    %52 = vector.extract_strided_slice %1 {offsets = [0, 3], sizes = [8, 1], strides = [1, 1]} : vector<8x4xf32> to vector<8x1xf32>
    %53 = vector.extract_strided_slice %34 {offsets = [3, 0], sizes = [1, 256], strides = [1, 1]} : vector<4x256xf32> to vector<1x256xf32>
    %54 = vector.broadcast %52 : vector<8x1xf32> to vector<8x256xf32>
    %55 = vector.broadcast %53 : vector<1x256xf32> to vector<8x256xf32>
    %56 = arith.mulf %54, %55 : vector<8x256xf32>
    %57 = arith.addf %51, %56 : vector<8x256xf32>
    %58 = vector.broadcast %2 : vector<8x1xf32> to vector<8x256xf32>
    %59 = arith.addf %57, %58 : vector<8x256xf32>
    %c1 = arith.constant 1 : index
    %c0_9 = arith.constant 0 : index
    %c0_10 = arith.constant 0 : index
    %60 = vector.load %arg5[%c1, %c0_9, %c0_10] : memref<2x8x256xf32, #tpu.memory_space<vmem>>, vector<1x8x256xf32>
    %61 = vector.shape_cast %60 : vector<1x8x256xf32> to vector<8x256xf32>
    %62 = vector.shape_cast %59 : vector<8x256xf32> to vector<1x8x256xf32>
    tpu.vector_store %arg5[%c1, %c0_9, %c0_10], %62 {strides = array<i32>} : memref<2x8x256xf32, #tpu.memory_space<vmem>>, vector<1x8x256xf32>,
    return
  }
  func.func @transform_0(%arg0: i32, %arg1: i32) -> (i32, i32, i32) {
    %c0_i32 = arith.constant 0 : i32
    %c0_i32_0 = arith.constant 0 : i32
    return %arg0, %c0_i32, %arg1 : i32, i32, i32
  }
  func.func @transform_1(%arg0: i32, %arg1: i32) -> (i32, i32) {
    %c0_i32 = arith.constant 0 : i32
    %c0_i32_0 = arith.constant 0 : i32
    %c0_i32_1 = arith.constant 0 : i32
    return %c0_i32, %c0_i32_0 : i32, i32
  }
  func.func @transform_2(%arg0: i32, %arg1: i32) -> (i32, i32) {
    %c0_i32 = arith.constant 0 : i32
    %c0_i32_0 = arith.constant 0 : i32
    %c0_i32_1 = arith.constant 0 : i32
    return %c0_i32, %c0_i32_0 : i32, i32
  }
  func.func @transform_3(%arg0: i32, %arg1: i32) -> (i32, i32, i32) {
    %c0_i32 = arith.constant 0 : i32
    %c0_i32_0 = arith.constant 0 : i32
    return %arg0, %c0_i32, %arg1 : i32, i32, i32
  }
}

</mosaic_0001>

<bundles_post_ra>
// kernel: conv2dn_forward.2
= control target key start
LH: loop header
LB: loop body
LE: loop exit
PB: predicated region body
PF: predicated region fallthrough
CT: control target
= control target key end

     0   :  { %vm23_vm0 = vcmask 1043456   ;;  %vm16_vm1 = vcmask 3072   ;;  %v198_v10 = vmov 0.0   ;;  %vm14_vm2 = vcmask 27648   ;;  %s238_s0 = inlined_call_operand.vmem [shape: f32[2,4,256], index: 0, kind: input, shape index: {}]   ;;  %s239_s2 = inlined_call_operand.vmem [shape: f32[1,4,1], index: 2, kind: output, shape index: {1}]   ;;  %s240_s1 = inlined_call_operand.vmem [shape: f32[1,4,4], index: 1, kind: output, shape index: {0}]  }
   0x1   :  { %v19_v0 = vld [vmem:[%s238_s0 + $0x8] sm:$0xff]  ;;  %v18_v1 = vld [vmem:[%s238_s0] sm:$0xff]  ;;  %17 = vst.msk [vmem:[%s239_s2] sm:$0xf] %vm16_vm1, %v198_v10 }
   0x2   :  { %v31_v2 = vcombine.high %v19_v0, %v19_v0  ;;  %v21_v3 = vcombine.high %v18_v1, %v18_v1  ;;  %v24_v4 = vsel %vm23_vm0, %v18_v1, 0.0  ;;  %v173_v6 = vsel %vm23_vm0, %v19_v0, 0.0  ;;  %15 = vst.msk [vmem:[%s240_s1] sm:$0xf] %vm14_vm2, %v198_v10 }
   0x4   :  { %33 = vmatprep.subr.mxu0 %v31_v2  ;;  %103 = vmatprep.subr.mxu1 %v21_v3  ;;  %v25_v5 = vsel %vm23_vm0, %v21_v3, 0.0  ;;  %v174_v7 = vsel %vm23_vm0, %v31_v2, 0.0 }
   0x5   :  { %34 = vmatpush1.xpose.msra.mxu0 %v19_v0  ;;  %104 = vmatpush1.xpose.msra.mxu1 %v18_v1  ;;  %v26_v8 = vadd.f32 %v25_v5, %v24_v4  ;;  %v175_v9 = vadd.f32 %v174_v7, %v173_v6 }
   0x6   :  { %97 = vmatprep.mubr.f32.mxu0 %v31_v2  ;;  %167 = vmatprep.mubr.f32.mxu1 %v21_v3 }
   0x7   :  { %27 = vadd.xlane.f32.xlu0 %v26_v8 }
   0x8   :  { %98 = vmatmul.mubr.f32.vlgmr.msra.gmra.mrb[0].mxu0 %v19_v0  ;;  %168 = vmatmul.mubr.f32.vlgmr.msra.gmra.mrb[0].mxu1 %v18_v1  ;;  %v183_v12 = vld [vmem:[%s239_s2] sm:$0xf] }
   0x9   :  { %v179_v18 = vld [vmem:[%s240_s1] sm:$0xf] }
   0xb   :  { %176 = vadd.xlane.f32.xlu0 %v175_v9 }
  0x94   :  { %v28_v11 = vpop.xlane.xlu0 %27 }
  0x98   :  { %v177_v13 = vpop.xlane.xlu0 %176 }
  0x99   :  { %v178_v14 = vadd.f32 %v177_v13, %v28_v11 }
  0x9b   :  { %v184_v15 = vadd.f32 %v183_v12, %v178_v14 }
  0x9d   :  { %186 = vst.msk [vmem:[%s239_s2] sm:$0xf] %vm16_vm1, %v184_v15 }
  0xdb   :  { %v99_v16 = vpop.f32.mrb[0].mxu0  ;;  %v169_v17 = vpop.f32.mrb[0].mxu1 }
  0xdc   :  { %v170_v19 = vadd.f32 %v169_v17, %v99_v16  ;;  %v101_v20 = vpop.f32.mrb[1].mxu0  ;;  %v171_v21 = vpop.f32.mrb[1].mxu1 }
  0xde   :  { %v180_v22 = vadd.f32 %v179_v18, %v170_v19 }
  0xe0   :  { %182 = vst.msk [vmem:[%s240_s1] sm:$0xf] %vm14_vm2, %v180_v22 }

// kernel: conv2dn_forward.3
= control target key start
LH: loop header
LB: loop body
LE: loop exit
PB: predicated region body
PF: predicated region fallthrough
CT: control target
= control target key end

     0   :  { %v239_v0 = vmov 0   ;;  %v240_v2 = vmov 2   ;;  %v241_v3 = vmov 1   ;;  %v242_v4 = vmov 3   ;;  %s287_s1 = inlined_call_operand.vmem [shape: f32[8,4], index: 1, kind: input, shape index: {}]   ;;  %s288_s2 = inlined_call_operand.vmem [shape: f32[8,1], index: 2, kind: input, shape index: {}]   ;;  %s289_s0 = inlined_call_operand.vmem [shape: f32[2,4,256], index: 0, kind: input, shape index: {}]   ;;  %s290_s3 = inlined_call_operand.vmem [shape: f32[2,8,256], index: 3, kind: output, shape index: {}]  }
   0x1   :  { %233 = vset.pattern.permute.xlu0 %v239_v0  ;;  %v16_v1 = vld [vmem:[%s287_s1] sm:$0xff]  ;;  %235 = vset.pattern.permute.xlu1 %v240_v2  ;;  %v24_v6 = vlaneseq  ;;  %v15_v11 = vld [vmem:[%s289_s0 + $0x8] sm:$0xff] }
   0x2   :  { %20 = vperm.xlu0 %233, %v16_v1   ;;  %71 = vperm.xlu1 %235, %v16_v1   ;;  %v17_v5 = vld [vmem:[%s288_s2] sm:$0xff] }
   0x3   :  { %v25_v7 = vshrl.u32 %v24_v6, 7  ;;  %v14_v10 = vld [vmem:[%s289_s0] sm:$0xff] }
   0x5   :  { %v26_v8 = vsub.s32 0, %v25_v7  ;;  %v30_v9 = vsub.s32 4, %v25_v7  ;;  %v76_v12 = vsub.s32 2, %v25_v7  ;;  %v80_v13 = vsub.s32 6, %v25_v7 }
   0x6   :  { %234 = vset.pattern.permute.xlu0 %v241_v3  ;;  %236 = vset.pattern.permute.xlu1 %v242_v4  ;;  %v50_v14 = vsub.s32 1, %v25_v7  ;;  %v54_v15 = vsub.s32 5, %v25_v7  ;;  %v102_v16 = vsub.s32 3, %v25_v7  ;;  %v106_v17 = vsub.s32 7, %v25_v7 }
   0x7   :  { %45 = vperm.xlu0 %234, %v16_v1   ;;  %97 = vperm.xlu1 %236, %v16_v1   ;;  %v27_v18 = vrot.slane %v14_v10, %v26_v8  ;;  %v31_v19 = vrot.slane %v14_v10, %v30_v9  ;;  %v135_v20 = vrot.slane %v15_v11, %v26_v8 }
   0x8   :  { %v139_v21 = vrot.slane %v15_v11, %v30_v9  ;;  %v77_v22 = vrot.slane %v14_v10, %v76_v12  ;;  %v81_v23 = vrot.slane %v14_v10, %v80_v13  ;;  %v177_v24 = vrot.slane %v15_v11, %v76_v12 }
   0x9   :  { %v181_v25 = vrot.slane %v15_v11, %v80_v13  ;;  %v51_v26 = vrot.slane %v14_v10, %v50_v14  ;;  %v55_v27 = vrot.slane %v14_v10, %v54_v15  ;;  %v155_v28 = vrot.slane %v15_v11, %v50_v14 }
   0xa   :  { %v159_v29 = vrot.slane %v15_v11, %v54_v15  ;;  %v103_v30 = vrot.slane %v14_v10, %v102_v16  ;;  %v107_v31 = vrot.slane %v14_v10, %v106_v17  ;;  %v199_v32 = vrot.slane %v15_v11, %v102_v16 }
   0xb   :  { %237 = vset.pattern.permute.xlu1 %v239_v0  ;;  %238 = vset.pattern.permute.xlu0 %v239_v0  ;;  %v203_v33 = vrot.slane %v15_v11, %v106_v17  ;;  %v37_v35 = vrot.slane %v27_v18, %v26_v8  ;;  %v41_v36 = vrot.slane %v31_v19, %v26_v8 }
   0xc   :  { %124 = vperm.xlu1 %237, %v17_v5   ;;  %v145_v37 = vrot.slane %v135_v20, %v26_v8  ;;  %v149_v38 = vrot.slane %v139_v21, %v26_v8  ;;  %v87_v40 = vrot.slane %v77_v22, %v76_v12  ;;  %v91_v41 = vrot.slane %v81_v23, %v76_v12 }
   0xd   :  { %v187_v42 = vrot.slane %v177_v24, %v76_v12  ;;  %v191_v43 = vrot.slane %v181_v25, %v76_v12  ;;  %v61_v44 = vrot.slane %v51_v26, %v50_v14  ;;  %v65_v45 = vrot.slane %v55_v27, %v50_v14 }
   0xe   :  { %v165_v46 = vrot.slane %v155_v28, %v50_v14  ;;  %v169_v47 = vrot.slane %v159_v29, %v50_v14  ;;  %v113_v48 = vrot.slane %v103_v30, %v102_v16  ;;  %v117_v49 = vrot.slane %v107_v31, %v102_v16 }
   0xf   :  { %v209_v50 = vrot.slane %v199_v32, %v102_v16  ;;  %v213_v51 = vrot.slane %v203_v33, %v102_v16 }
  0x81   :  { %v21_v34 = vpop.permute.xlu0 %20  ;;  %v72_v39 = vpop.permute.xlu1 %71 }
  0x82   :  { %v42_v52 = vmul.f32 %v37_v35, %v21_v34  ;;  %v43_v53 = vmul.f32 %v41_v36, %v21_v34  ;;  %v150_v54 = vmul.f32 %v145_v37, %v21_v34  ;;  %v151_v55 = vmul.f32 %v149_v38, %v21_v34 }
  0x83   :  { %v92_v56 = vmul.f32 %v87_v40, %v72_v39  ;;  %v93_v57 = vmul.f32 %v91_v41, %v72_v39  ;;  %v192_v58 = vmul.f32 %v187_v42, %v72_v39  ;;  %v193_v59 = vmul.f32 %v191_v43, %v72_v39 }
  0x86   :  { %v46_v60 = vpop.permute.xlu0 %45  ;;  %v98_v61 = vpop.permute.xlu1 %97 }
  0x87   :  { %v66_v62 = vmul.f32 %v61_v44, %v46_v60  ;;  %v67_v63 = vmul.f32 %v65_v45, %v46_v60  ;;  %v170_v0 = vmul.f32 %v165_v46, %v46_v60  ;;  %v171_v1 = vmul.f32 %v169_v47, %v46_v60 }
  0x88   :  { %v118_v2 = vmul.f32 %v113_v48, %v98_v61  ;;  %v119_v3 = vmul.f32 %v117_v49, %v98_v61  ;;  %v214_v4 = vmul.f32 %v209_v50, %v98_v61  ;;  %v215_v5 = vmul.f32 %v213_v51, %v98_v61 }
  0x89   :  { %v68_v6 = vadd.f32 %v66_v62, %v42_v52  ;;  %v69_v7 = vadd.f32 %v67_v63, %v43_v53  ;;  %v172_v8 = vadd.f32 %v170_v0, %v150_v54  ;;  %v173_v9 = vadd.f32 %v171_v1, %v151_v55 }
  0x8b   :  { %v94_v10 = vadd.f32 %v92_v56, %v68_v6  ;;  %v95_v11 = vadd.f32 %v93_v57, %v69_v7  ;;  %v194_v12 = vadd.f32 %v192_v58, %v172_v8  ;;  %v195_v13 = vadd.f32 %v193_v59, %v173_v9  ;;  %v125_v14 = vpop.permute.xlu1 %124 }
  0x8d   :  { %v120_v15 = vadd.f32 %v118_v2, %v94_v10  ;;  %v121_v16 = vadd.f32 %v119_v3, %v95_v11  ;;  %v216_v17 = vadd.f32 %v214_v4, %v194_v12  ;;  %v217_v18 = vadd.f32 %v215_v5, %v195_v13 }
  0x8f   :  { %v127_v19 = vadd.f32 %v125_v14, %v120_v15  ;;  %v128_v20 = vadd.f32 %v125_v14, %v121_v16  ;;  %v218_v21 = vadd.f32 %v216_v17, %v125_v14  ;;  %v219_v22 = vadd.f32 %v217_v18, %v125_v14 }
  0x91   :  { %129 = vst [vmem:[%s290_s3] sm:$0xff] %v127_v19  ;;  %130 = vst [vmem:[%s290_s3 + $0x8] sm:$0xff] %v128_v20 }
  0x92   :  { %227 = vst [vmem:[%s290_s3 + $0x10] sm:$0xff] %v218_v21  ;;  %228 = vst [vmem:[%s290_s3 + $0x18] sm:$0xff] %v219_v22 }

</bundles_post_ra>
